<compile_context>
chip_gen: v6e
topology: v6e:2x2x1
jax: 0.10.0
libtpu: 0.0.40
codegen_flags: <defaults>
</compile_context>

<pallas_src>
import math

import jax
import jax.numpy as jnp
from jax import lax
from jax.experimental import pallas as pl
from jax.experimental.pallas import tpu as pltpu

BN_EPS = 1e-5
LANE = 128


def _round_up(x, m):
    return ((x + m - 1) // m) * m


def _pad2(a, shape):
    """Zero-pad a 2-D array up to `shape` (trailing padding only)."""
    pr = shape[0] - a.shape[0]
    pc = shape[1] - a.shape[1]
    if pr == 0 and pc == 0:
        return a
    return jnp.pad(a, ((0, pr), (0, pc)))


def _make_kernel(n_true, approximate_gelu):
    """Build the fused kernel. `n_true` = un-padded batch size (BN divisor)."""

    inv_n = 1.0 / float(n_true)

    def kernel(x_ref, w1_ref, gamma_ref, beta_ref, w2_ref, b2_ref, o_ref, stats_ref):
        phase = pl.program_id(0)          # 0 = BN stats pass, 1 = normalize/compute pass
        tile = pl.program_id(1)
        n_tiles = pl.num_programs(1)

        x = x_ref[...]                    # (TN, Cp) f32 (residual needs f32 copy anyway)
        mxu_dtype = w1_ref.dtype          # bf16 by default, f32 if requested

        # --- Linear 1 (bias omitted: cancels exactly under train-mode BN) ------------
        h = jnp.dot(x.astype(mxu_dtype), w1_ref[...],
                    preferred_element_type=jnp.float32)        # (TN, Hp) f32

        # --- Phase 0: accumulate one-pass BN statistics ------------------------------
        @pl.when(phase == 0)
        def _():
            @pl.when(tile == 0)
            def _():
                stats_ref[...] = jnp.zeros_like(stats_ref)

            stats_ref[0:1, :] += jnp.sum(h, axis=0, keepdims=True)        # sum
            stats_ref[1:2, :] += jnp.sum(h * h, axis=0, keepdims=True)    # sum of squares

            # Last stats tile: fold stats into scale/shift (overwrites the scratch).
            @pl.when(tile == n_tiles - 1)
            def _():
                mean = stats_ref[0:1, :] * inv_n
                var = jnp.maximum(stats_ref[1:2, :] * inv_n - mean * mean, 0.0)
                scale = gamma_ref[...] * lax.rsqrt(var + BN_EPS)          # EUP rsqrt
                stats_ref[0:1, :] = scale
                stats_ref[1:2, :] = beta_ref[...] - mean * scale

        # --- Phase 1: normalize + GELU + Linear 2 + residual --------------------------
        @pl.when(phase == 1)
        def _():
            h_bn = h * stats_ref[0:1, :] + stats_ref[1:2, :]              # 2 VPU ops/elem
            if approximate_gelu:
                c = math.sqrt(2.0 / math.pi)
                g = 0.5 * h_bn * (1.0 + jnp.tanh(c * (h_bn + 0.044715 * h_bn * h_bn * h_bn)))
            else:
                g = 0.5 * h_bn * (1.0 + lax.erf(h_bn * (1.0 / math.sqrt(2.0))))

            y = jnp.dot(g.astype(mxu_dtype), w2_ref[...],
                        preferred_element_type=jnp.float32)               # (TN, Cp)
            o_ref[...] = (y + b2_ref[...] + x).astype(o_ref.dtype)

    return kernel


def prepare_params(w1, b1, gamma, beta, w2, b2, *, mxu_dtype=jnp.bfloat16):
    """Pad (lane-dense, 128) and cast parameters ONCE at init time.

    b1 is accepted for interface parity but is mathematically redundant under
    training-mode BatchNorm (the batch-mean subtraction cancels it exactly).
    """
    del b1
    cin, hid = w1.shape
    cout = w2.shape[1]

    cin_p = _round_up(cin, LANE)
    hid_p = _round_up(hid, LANE)
    cout_p = _round_up(cout, LANE)

    return {
        "w1": _pad2(w1, (cin_p, hid_p)).astype(mxu_dtype),     # MXU operand
        "gamma": _pad2(gamma, (1, hid_p)).astype(jnp.float32),  # elementwise path stays f32
        "beta": _pad2(beta, (1, hid_p)).astype(jnp.float32),
        "w2": _pad2(w2, (hid_p, cout_p)).astype(mxu_dtype),     # MXU operand
        "b2": _pad2(b2, (1, cout_p)).astype(jnp.float32),
        "in_features": cin,
        "hidden_features": hid,
        "out_features": cout,
    }


def two_layer_nn(x, params, *, block_n=128, approximate_gelu=False):
    """x: (N, in_features) f32. `params` from prepare_params."""
    n, cin = x.shape
    assert cin == params["in_features"]
    assert params["out_features"] == cin, "residual requires out_features == in_features"

    cin_p, hid_p = params["w1"].shape
    cout_p = params["w2"].shape[1]

    # Batch tiling: tile height multiple of 8 sublanes; pad N with zero rows (excluded
    # from BN stats by construction — zero rows produce h == 0 since there is no b1).
    tn = _round_up(min(block_n, n), 8)
    n_p = _round_up(n, tn)
    n_tiles = n_p // tn
    xp = _pad2(x, (n_p, cin_p))

    itemsize = jnp.dtype(params["w1"].dtype).itemsize
    w_bytes = (cin_p * hid_p + hid_p * cout_p) * itemsize
    resident = w_bytes + (4 * hid_p + cout_p) * 4                 # weights + vectors + scratch
    streamed = 2 * tn * (cin_p + cout_p) * 4                      # double-buffered x/out tiles
    vmem_limit = int(min(64 * 1024 * 1024, max(4 * 1024 * 1024, 2 * (resident + streamed))))

    flops = 2 * (2 * n_p * cin_p * hid_p) + 2 * n_p * hid_p * cout_p + 10 * n_p * hid_p
    cost = pl.CostEstimate(
        flops=flops,
        transcendentals=n_p * hid_p + hid_p,                      # erf (or tanh) + rsqrt
        bytes_accessed=4 * (2 * n_p * cin_p + n_p * cout_p + 2 * hid_p + cout_p) + w_bytes,
    )

    kernel = _make_kernel(n, approximate_gelu)

    grid_spec = pltpu.PrefetchScalarGridSpec(
        num_scalar_prefetch=0,
        grid=(2, n_tiles),                                        # (phase, batch tile)
        in_specs=[
            pl.BlockSpec((tn, cin_p), lambda p, i: (i, 0)),       # x: re-streamed each phase
            pl.BlockSpec((cin_p, hid_p), lambda p, i: (0, 0)),    # w1: VMEM-resident
            pl.BlockSpec((1, hid_p), lambda p, i: (0, 0)),        # gamma: resident
            pl.BlockSpec((1, hid_p), lambda p, i: (0, 0)),        # beta: resident
            pl.BlockSpec((hid_p, cout_p), lambda p, i: (0, 0)),   # w2: resident
            pl.BlockSpec((1, cout_p), lambda p, i: (0, 0)),       # b2: resident
        ],
        # During phase 0 the output block index stays 0 (resident, never written back);
        # phase 1 walks the tiles and each block is written back exactly once.
        out_specs=pl.BlockSpec((tn, cout_p), lambda p, i: (i * p, 0)),
        scratch_shapes=[pltpu.VMEM((2, hid_p), jnp.float32)],     # sum/sumsq -> scale/shift
    )

    out_p = pl.pallas_call(
        kernel,
        out_shape=jax.ShapeDtypeStruct((n_p, cout_p), x.dtype),
        grid_spec=grid_spec,
        cost_estimate=cost,
        compiler_params=pltpu.CompilerParams(
            # Cross-tile BN stats make every step order-dependent -> "arbitrary".
            dimension_semantics=("arbitrary", "arbitrary"),
            vmem_limit_bytes=vmem_limit,
        ),
    )(xp, params["w1"], params["gamma"], params["beta"], params["w2"], params["b2"])

    return out_p[:n, :params["out_features"]]


def _reference(x, w1, b1, gamma, beta, w2, b2):
    """Pure-JAX reference matching PyTorch semantics (training-mode BN, exact GELU)."""
    h = jnp.dot(x, w1, precision=lax.Precision.HIGHEST) + b1
    mean = jnp.mean(h, axis=0, keepdims=True)
    var = jnp.mean((h - mean) ** 2, axis=0, keepdims=True)
    h = (h - mean) * lax.rsqrt(var + BN_EPS) * gamma + beta
    g = 0.5 * h * (1.0 + lax.erf(h / math.sqrt(2.0)))
    return jnp.dot(g, w2, precision=lax.Precision.HIGHEST) + b2 + x


if __name__ == "__main__":
    key = jax.random.PRNGKey(0)

    batch = 20                    # deliberately NOT a multiple of the tile -> exercises row padding
    in_features = 16
    hidden_features = 32
    out_features = in_features    # residual add requires this

    ks = jax.random.split(key, 7)
    x = jax.random.normal(ks[0], (batch, in_features), dtype=jnp.float32)

    # Deterministic init mimicking nn.Linear's kaiming-uniform bounds.
    bound1 = 1.0 / math.sqrt(in_features)
    w1 = jax.random.uniform(ks[1], (in_features, hidden_features),
                            minval=-bound1, maxval=bound1, dtype=jnp.float32)
    b1 = jax.random.uniform(ks[2], (1, hidden_features),
                            minval=-bound1, maxval=bound1, dtype=jnp.float32)
    bound2 = 1.0 / math.sqrt(hidden_features)
    w2 = jax.random.uniform(ks[3], (hidden_features, out_features),
                            minval=-bound2, maxval=bound2, dtype=jnp.float32)
    b2 = jax.random.uniform(ks[4], (1, out_features),
                            minval=-bound2, maxval=bound2, dtype=jnp.float32)
    # Non-trivial BN affine params to exercise the scale/shift path.
    gamma = jax.random.uniform(ks[5], (1, hidden_features),
                               minval=0.5, maxval=1.5, dtype=jnp.float32)
    beta = jax.random.uniform(ks[6], (1, hidden_features),
                              minval=-0.2, maxval=0.2, dtype=jnp.float32)

    ref = _reference(x, w1, b1, gamma, beta, w2, b2)

    # bf16-MXU path (default), tiny batch tiles to exercise the multi-tile two-pass BN
    # and the zero-padded-row handling (20 rows -> 3 tiles of 8).
    params_bf16 = prepare_params(w1, b1, gamma, beta, w2, b2, mxu_dtype=jnp.bfloat16)
    out_bf16 = jax.block_until_ready(two_layer_nn(x, params_bf16, block_n=8))
    assert out_bf16.shape == (batch, out_features)
    err_bf16 = float(jnp.max(jnp.abs(out_bf16 - ref)))
    assert err_bf16 < 7e-2, f"bf16 path mismatch vs reference: max abs err {err_bf16}"

    # f32-MXU path, whole batch in a single tile (tolerance allows for MXU pass precision).
    params_f32 = prepare_params(w1, b1, gamma, beta, w2, b2, mxu_dtype=jnp.float32)
    out_f32 = jax.block_until_ready(two_layer_nn(x, params_f32))
    assert out_f32.shape == (batch, out_features)
    err_f32 = float(jnp.max(jnp.abs(out_f32 - ref)))
    assert err_f32 < 2e-2, f"f32 path mismatch vs reference: max abs err {err_f32}"

    print("KERNEL_OK")
</pallas_src>

<mosaic_0001>
module attributes {stable_mosaic.version = 11 : i64} {
  func.func @kernel(%arg0: i32, %arg1: i32, %arg2: memref<8x128xf32, #tpu.memory_space<vmem>>, %arg3: memref<128x128xbf16, #tpu.memory_space<vmem>>, %arg4: memref<1x128xf32, #tpu.memory_space<vmem>>, %arg5: memref<1x128xf32, #tpu.memory_space<vmem>>, %arg6: memref<128x128xbf16, #tpu.memory_space<vmem>>, %arg7: memref<1x128xf32, #tpu.memory_space<vmem>>, %arg8: memref<8x128xf32, #tpu.memory_space<vmem>>, %arg9: memref<2x128xf32, #tpu.memory_space<vmem>>) attributes {dimension_semantics = [#tpu.dimension_semantics<arbitrary>, #tpu.dimension_semantics<arbitrary>], iteration_bounds = array<i64: 2, 3>, scalar_prefetch = 0 : i64, scratch_operands = 1 : i64, tpu.core_type = #tpu.core_type<tc>, window_params = [{transform_indices = @transform_0, window_bounds = array<i64: 8, 128>}, {pipeline_mode = #tpu.pipeline_mode<synchronous>, transform_indices = @transform_1, window_bounds = array<i64: 128, 128>}, {pipeline_mode = #tpu.pipeline_mode<synchronous>, transform_indices = @transform_2, window_bounds = array<i64: 1, 128>}, {pipeline_mode = #tpu.pipeline_mode<synchronous>, transform_indices = @transform_3, window_bounds = array<i64: 1, 128>}, {pipeline_mode = #tpu.pipeline_mode<synchronous>, transform_indices = @transform_4, window_bounds = array<i64: 128, 128>}, {pipeline_mode = #tpu.pipeline_mode<synchronous>, transform_indices = @transform_5, window_bounds = array<i64: 1, 128>}, {transform_indices = @transform_6, window_bounds = array<i64: 8, 128>}]} {
    %c0 = arith.constant 0 : index
    %c0_0 = arith.constant 0 : index
    %0 = vector.load %arg2[%c0, %c0_0] : memref<8x128xf32, #tpu.memory_space<vmem>>, vector<8x128xf32>
    %1 = arith.truncf %0 : vector<8x128xf32> to vector<8x128xbf16>
    %c0_1 = arith.constant 0 : index
    %c0_2 = arith.constant 0 : index
    %2 = vector.load %arg3[%c0_1, %c0_2] : memref<128x128xbf16, #tpu.memory_space<vmem>>, vector<128x128xbf16>
    %cst = arith.constant dense<0.000000e+00> : vector<8x128xf32>
    %3 = tpu.matmul %1, %2, %cst {dimension_numbers = #tpu.dot_dimension_numbers<[1], [0], [0], [1], [0, 0, 1, 1], [], []>} : vector<8x128xbf16>, vector<128x128xbf16>, vector<8x128xf32> -> vector<8x128xf32>
    %c0_i32 = arith.constant 0 : i32
    %4 = arith.cmpi eq, %arg0, %c0_i32 : i32
    %5 = arith.extui %4 : i1 to i32
    %c0_i32_3 = arith.constant 0 : i32
    %6 = arith.cmpi ne, %5, %c0_i32_3 : i32
    scf.if %6 {
      %c0_i32_5 = arith.constant 0 : i32
      %10 = arith.cmpi eq, %arg1, %c0_i32_5 : i32
      %11 = arith.extui %10 : i1 to i32
      %c0_i32_6 = arith.constant 0 : i32
      %12 = arith.cmpi ne, %11, %c0_i32_6 : i32
      scf.if %12 {
        %cst_17 = arith.constant 0.000000e+00 : f32
        %27 = vector.broadcast %cst_17 : f32 to vector<2x128xf32>
        %c0_18 = arith.constant 0 : index
        %c0_19 = arith.constant 0 : index
        %28 = vector.load %arg9[%c0_18, %c0_19] : memref<2x128xf32, #tpu.memory_space<vmem>>, vector<2x128xf32>
        tpu.vector_store %arg9[%c0_18, %c0_19], %27 {strides = array<i32>} : memref<2x128xf32, #tpu.memory_space<vmem>>, vector<2x128xf32>,
      } else {
      }
      %c0_7 = arith.constant 0 : index
      %c0_8 = arith.constant 0 : index
      %13 = vector.load %arg9[%c0_7, %c0_8] : memref<2x128xf32, #tpu.memory_space<vmem>>, vector<1x128xf32>
      %cst_9 = arith.constant dense<0.000000e+00> : vector<128xf32>
      %14 = vector.multi_reduction <add>, %3, %cst_9 [0] : vector<8x128xf32> to vector<128xf32>
      %15 = vector.shape_cast %14 : vector<128xf32> to vector<1x128xf32>
      %16 = arith.addf %13, %15 : vector<1x128xf32>
      %c0_10 = arith.constant 0 : index
      %c0_11 = arith.constant 0 : index
      %17 = vector.load %arg9[%c0_10, %c0_11] : memref<2x128xf32, #tpu.memory_space<vmem>>, vector<1x128xf32>
      tpu.vector_store %arg9[%c0_10, %c0_11], %16 {strides = array<i32>} : memref<2x128xf32, #tpu.memory_space<vmem>>, vector<1x128xf32>,
      %c1 = arith.constant 1 : index
      %c0_12 = arith.constant 0 : index
      %18 = vector.load %arg9[%c1, %c0_12] : memref<2x128xf32, #tpu.memory_space<vmem>>, vector<1x128xf32>
      %19 = arith.mulf %3, %3 : vector<8x128xf32>
      %cst_13 = arith.constant dense<0.000000e+00> : vector<128xf32>
      %20 = vector.multi_reduction <add>, %19, %cst_13 [0] : vector<8x128xf32> to vector<128xf32>
      %21 = vector.shape_cast %20 : vector<128xf32> to vector<1x128xf32>
      %22 = arith.addf %18, %21 : vector<1x128xf32>
      %c1_14 = arith.constant 1 : index
      %c0_15 = arith.constant 0 : index
      %23 = vector.load %arg9[%c1_14, %c0_15] : memref<2x128xf32, #tpu.memory_space<vmem>>, vector<1x128xf32>
      tpu.vector_store %arg9[%c1_14, %c0_15], %22 {strides = array<i32>} : memref<2x128xf32, #tpu.memory_space<vmem>>, vector<1x128xf32>,
      %c2_i32 = arith.constant 2 : i32
      %24 = arith.cmpi eq, %arg1, %c2_i32 : i32
      %25 = arith.extui %24 : i1 to i32
      %c0_i32_16 = arith.constant 0 : i32
      %26 = arith.cmpi ne, %25, %c0_i32_16 : i32
      scf.if %26 {
        %c0_17 = arith.constant 0 : index
        %c0_18 = arith.constant 0 : index
        %27 = vector.load %arg9[%c0_17, %c0_18] : memref<2x128xf32, #tpu.memory_space<vmem>>, vector<1x128xf32>
        %cst_19 = arith.constant 5.000000e-02 : f32
        %28 = vector.broadcast %cst_19 : f32 to vector<1x128xf32>
        %29 = arith.mulf %27, %28 : vector<1x128xf32>
        %c1_20 = arith.constant 1 : index
        %c0_21 = arith.constant 0 : index
        %30 = vector.load %arg9[%c1_20, %c0_21] : memref<2x128xf32, #tpu.memory_space<vmem>>, vector<1x128xf32>
        %cst_22 = arith.constant 5.000000e-02 : f32
        %31 = vector.broadcast %cst_22 : f32 to vector<1x128xf32>
        %32 = arith.mulf %30, %31 : vector<1x128xf32>
        %33 = arith.mulf %29, %29 : vector<1x128xf32>
        %34 = arith.subf %32, %33 : vector<1x128xf32>
        %cst_23 = arith.constant 0.000000e+00 : f32
        %35 = vector.broadcast %cst_23 : f32 to vector<1x128xf32>
        %36 = arith.maximumf %34, %35 : vector<1x128xf32>
        %c0_24 = arith.constant 0 : index
        %c0_25 = arith.constant 0 : index
        %37 = vector.load %arg4[%c0_24, %c0_25] : memref<1x128xf32, #tpu.memory_space<vmem>>, vector<1x128xf32>
        %cst_26 = arith.constant 9.99999974E-6 : f32
        %38 = vector.broadcast %cst_26 : f32 to vector<1x128xf32>
        %39 = arith.addf %36, %38 : vector<1x128xf32>
        %40 = math.rsqrt %39 : vector<1x128xf32>
        %41 = arith.mulf %37, %40 : vector<1x128xf32>
        %c0_27 = arith.constant 0 : index
        %c0_28 = arith.constant 0 : index
        %42 = vector.load %arg9[%c0_27, %c0_28] : memref<2x128xf32, #tpu.memory_space<vmem>>, vector<1x128xf32>
        tpu.vector_store %arg9[%c0_27, %c0_28], %41 {strides = array<i32>} : memref<2x128xf32, #tpu.memory_space<vmem>>, vector<1x128xf32>,
        %c0_29 = arith.constant 0 : index
        %c0_30 = arith.constant 0 : index
        %43 = vector.load %arg5[%c0_29, %c0_30] : memref<1x128xf32, #tpu.memory_space<vmem>>, vector<1x128xf32>
        %44 = arith.mulf %29, %41 : vector<1x128xf32>
        %45 = arith.subf %43, %44 : vector<1x128xf32>
        %c1_31 = arith.constant 1 : index
        %c0_32 = arith.constant 0 : index
        %46 = vector.load %arg9[%c1_31, %c0_32] : memref<2x128xf32, #tpu.memory_space<vmem>>, vector<1x128xf32>
        tpu.vector_store %arg9[%c1_31, %c0_32], %45 {strides = array<i32>} : memref<2x128xf32, #tpu.memory_space<vmem>>, vector<1x128xf32>,
      } else {
      }
    } else {
    }
    %c1_i32 = arith.constant 1 : i32
    %7 = arith.cmpi eq, %arg0, %c1_i32 : i32
    %8 = arith.extui %7 : i1 to i32
    %c0_i32_4 = arith.constant 0 : i32
    %9 = arith.cmpi ne, %8, %c0_i32_4 : i32
    scf.if %9 {
      %c0_5 = arith.constant 0 : index
      %c0_6 = arith.constant 0 : index
      %10 = vector.load %arg9[%c0_5, %c0_6] : memref<2x128xf32, #tpu.memory_space<vmem>>, vector<1x128xf32>
      %11 = vector.broadcast %10 : vector<1x128xf32> to vector<8x128xf32>
      %12 = arith.mulf %3, %11 : vector<8x128xf32>
      %c1 = arith.constant 1 : index
      %c0_7 = arith.constant 0 : index
      %13 = vector.load %arg9[%c1, %c0_7] : memref<2x128xf32, #tpu.memory_space<vmem>>, vector<1x128xf32>
      %14 = vector.broadcast %13 : vector<1x128xf32> to vector<8x128xf32>
      %15 = arith.addf %12, %14 : vector<8x128xf32>
      %cst_8 = arith.constant 5.000000e-01 : f32
      %16 = vector.broadcast %cst_8 : f32 to vector<8x128xf32>
      %17 = arith.mulf %16, %15 : vector<8x128xf32>
      %cst_9 = arith.constant 0.707106769 : f32
      %18 = vector.broadcast %cst_9 : f32 to vector<8x128xf32>
      %19 = arith.mulf %15, %18 : vector<8x128xf32>
      %20 = math.erf %19 : vector<8x128xf32>
      %cst_10 = arith.constant 1.000000e+00 : f32
      %21 = vector.broadcast %cst_10 : f32 to vector<8x128xf32>
      %22 = arith.addf %21, %20 : vector<8x128xf32>
      %23 = arith.mulf %17, %22 : vector<8x128xf32>
      %24 = arith.truncf %23 : vector<8x128xf32> to vector<8x128xbf16>
      %c0_11 = arith.constant 0 : index
      %c0_12 = arith.constant 0 : index
      %25 = vector.load %arg6[%c0_11, %c0_12] : memref<128x128xbf16, #tpu.memory_space<vmem>>, vector<128x128xbf16>
      %cst_13 = arith.constant dense<0.000000e+00> : vector<8x128xf32>
      %26 = tpu.matmul %24, %25, %cst_13 {dimension_numbers = #tpu.dot_dimension_numbers<[1], [0], [0], [1], [0, 0, 1, 1], [], []>} : vector<8x128xbf16>, vector<128x128xbf16>, vector<8x128xf32> -> vector<8x128xf32>
      %c0_14 = arith.constant 0 : index
      %c0_15 = arith.constant 0 : index
      %27 = vector.load %arg7[%c0_14, %c0_15] : memref<1x128xf32, #tpu.memory_space<vmem>>, vector<1x128xf32>
      %28 = vector.broadcast %27 : vector<1x128xf32> to vector<8x128xf32>
      %29 = arith.addf %26, %28 : vector<8x128xf32>
      %30 = arith.addf %29, %0 : vector<8x128xf32>
      %c0_16 = arith.constant 0 : index
      %c0_17 = arith.constant 0 : index
      %31 = vector.load %arg8[%c0_16, %c0_17] : memref<8x128xf32, #tpu.memory_space<vmem>>, vector<8x128xf32>
      tpu.vector_store %arg8[%c0_16, %c0_17], %30 {strides = array<i32>} : memref<8x128xf32, #tpu.memory_space<vmem>>, vector<8x128xf32>,
    } else {
    }
    return
  }
  func.func @transform_0(%arg0: i32, %arg1: i32) -> (i32, i32) {
    %c0_i32 = arith.constant 0 : i32
    %c0_i32_0 = arith.constant 0 : i32
    return %arg1, %c0_i32 : i32, i32
  }
  func.func @transform_1(%arg0: i32, %arg1: i32) -> (i32, i32) {
    %c0_i32 = arith.constant 0 : i32
    %c0_i32_0 = arith.constant 0 : i32
    %c0_i32_1 = arith.constant 0 : i32
    return %c0_i32, %c0_i32_0 : i32, i32
  }
  func.func @transform_2(%arg0: i32, %arg1: i32) -> (i32, i32) {
    %c0_i32 = arith.constant 0 : i32
    %c0_i32_0 = arith.constant 0 : i32
    %c0_i32_1 = arith.constant 0 : i32
    return %c0_i32, %c0_i32_0 : i32, i32
  }
  func.func @transform_3(%arg0: i32, %arg1: i32) -> (i32, i32) {
    %c0_i32 = arith.constant 0 : i32
    %c0_i32_0 = arith.constant 0 : i32
    %c0_i32_1 = arith.constant 0 : i32
    return %c0_i32, %c0_i32_0 : i32, i32
  }
  func.func @transform_4(%arg0: i32, %arg1: i32) -> (i32, i32) {
    %c0_i32 = arith.constant 0 : i32
    %c0_i32_0 = arith.constant 0 : i32
    %c0_i32_1 = arith.constant 0 : i32
    return %c0_i32, %c0_i32_0 : i32, i32
  }
  func.func @transform_5(%arg0: i32, %arg1: i32) -> (i32, i32) {
    %c0_i32 = arith.constant 0 : i32
    %c0_i32_0 = arith.constant 0 : i32
    %c0_i32_1 = arith.constant 0 : i32
    return %c0_i32, %c0_i32_0 : i32, i32
  }
  func.func @transform_6(%arg0: i32, %arg1: i32) -> (i32, i32) {
    %0 = arith.muli %arg1, %arg0 : i32
    %c0_i32 = arith.constant 0 : i32
    %c0_i32_0 = arith.constant 0 : i32
    return %0, %c0_i32 : i32, i32
  }
}

</mosaic_0001>

<bundles_post_ra>
// kernel: tpu_custom_call.1
= control target key start
LH: loop header
LB: loop body
LE: loop exit
PB: predicated region body
PF: predicated region fallthrough
CT: control target
= control target key end

     0   :  { %s1477_s0 = inlined_call_operand.hbm [shape: f32[24,128], index: 0, kind: input, shape index: {}]   ;;  %s1478_s1 = inlined_call_operand.hbm [shape: bf16[128,128], index: 1, kind: input, shape index: {}]   ;;  %s1479_s2 = inlined_call_operand.vmem [shape: f32[1,128], index: 2, kind: input, shape index: {}]   ;;  %s1480_s3 = inlined_call_operand.vmem [shape: f32[1,128], index: 3, kind: input, shape index: {}]   ;;  %s1481_s4 = inlined_call_operand.hbm [shape: bf16[128,128], index: 4, kind: input, shape index: {}]   ;;  %s1482_s5 = inlined_call_operand.vmem [shape: f32[1,128], index: 5, kind: input, shape index: {}]   ;;  %s1483_s6 = inlined_call_operand.hbm [shape: f32[24,128], index: 6, kind: output, shape index: {}]  }
   0x1   :  { %1494 = sst [smem:[#allocation18_spill]] %s1478_s1 }
   0x2   :  { %1495 = sst [smem:[#allocation19_spill]] %s1480_s3 }
   0x3   :  { %1496 = sst [smem:[#allocation20_spill]] %s1481_s4 }
   0x4   :  { %1497 = sst [smem:[#allocation21_spill]] %s1482_s5 }
   0x5   :  { %1498 = sst [smem:[#allocation22_spill]] %s1483_s6 }
   0x6   :  { %11 = vsyncpa [#allocation4], 0 }
   0x7   :  { %13 = vsyncpa [#allocation4 + $0x1], 0 }
   0x8   :  { %14 = vsyncpa [#allocation7], 0 }
   0x9   :  { %15 = vsyncpa [#allocation5], 0 }
   0xa   :  { %17 = vsyncpa [#allocation5 + $0x1], 0  ;;  %s1216_s21 = smov 0   ;;  %s1218_s22 = smov 0  }
   0xb   :  { %s1220_s23 = smov 0   ;;  %s1222_s24 = smov 0  }
   0xc   :  { %s1224_s25 = smov 0   ;;  %s1226_s26 = smov 0  }
   0xd   :  { %s1228_s27 = smov 0   ;;  %s1230_s28 = smov 0  }
   0xe   :  { %s1232_s29 = smov 0   ;;  %s1234_s30 = smov 0  }
   0xf   :  { %s1236_s7 = smov 0  }
  0x10 LB: > { %1499 = sst [smem:[#allocation13_spill]] %s1128_s21  ;;  %s716_s8 = sadd.s32 4294967295, %s1168_s7   ;;  %s1168_s7 = sphi %s1236_s7, %s23_s7   ;;  %s1164_s30 = sphi %s1234_s30, %s1524_s30   ;;  %s1160_s29 = sphi %s1232_s29, %s1532_s29   ;;  %s1156_s28 = sphi %s1230_s28, %s1523_s28   ;;  %s1152_s27 = sphi %s1228_s27, %s1531_s27   ;;  %s1148_s26 = sphi %s1226_s26, %s1530_s26   ;;  %s1144_s25 = sphi %s1224_s25, %s1529_s25   ;;  %s1140_s24 = sphi %s1222_s24, %s1528_s24   ;;  %s1136_s23 = sphi %s1220_s23, %s1527_s23   ;;  %s1132_s22 = sphi %s1218_s22, %s1526_s22   ;;  %s1128_s21 = sphi %s1216_s21, %s1525_s21  }
  0x11   : > { %1500 = sst [smem:[#allocation14_spill]] %s1164_s30  ;;  %s717_s9 = sadd.s32 4294967294, %s1168_s7  }
  0x12   : > { %p55_p0 = scmp.ne.s32.totalorder %s1144_s25, %s1140_s24  ;;  %p1272_p1 = scmp.eq.s32.totalorder %s716_s8, 0 }
  0x13   : > { %p185_p2 = scmp.ne.s32.totalorder %s1136_s23, %s1132_s22  ;;  %p186_p3 = scmp.eq.s32.totalorder %s716_s8, 5 }
  0x14   : > { %s1501_s10 = scalar_select %p1272_p1, 1, 0 }
  0x15   : > { %p1280_p4 = por %p1272_p1, %p55_p0  ;;  %p191_p5 = scmp.ne.s32.totalorder %s1132_s22, %s1128_s21 }
  0x16   : > { %p1286_p6 = por %p186_p3, %p185_p2  ;;  %p192_p7 = scmp.eq.s32.totalorder %s717_s9, 5 }
  0x17   : > { %p718_p8 = scmp.ge.s32.totalorder %s1168_s7, 1  ;;  %p199_p9 = scmp.lt.s32.totalorder %s1168_s7, 7 }
  0x18   : > { %s1503_s12 = scalar_select %p1286_p6, 1, 0 }
  0x19   : > { %p1292_p10 = por %p192_p7, %p191_p5  ;;  %p1296_p11 = pnand %p718_p8, %p199_p9 }
  0x1a   : > { %1504 = sst [smem:[#allocation15_spill]] %s1503_s12  ;;  %s1170_s15 = smov [#allocation6]  }
  0x1b   : > { %s1505_s13 = scalar_select %p1292_p10, 1, 0 }
  0x1c   : > { %s211_s16 = sshll.u32 %s1170_s15, 4  ;;  %p826_p12 = pneg %p1296_p11  ;;  %s212_s16 = int_to_ptr.vmem [resolvable:$true] %s211_s16 }
  0x1d   : > { %1506 = sst [smem:[#allocation16_spill]] %s1505_s13  ;;  %s1171_s18 = smov [#allocation8]  }
  0x1e   : > { %p1304_p13 = pnand %p826_p12, %p1272_p1  ;;  %s230_s19 = sshll.u32 %s1171_s18, 4  ;;  %s231_s19 = int_to_ptr.vmem [resolvable:$true] %s230_s19 }
  0x1f   : > { %s975_s20 = scalar_lea.vmem %s212_s16, 1024  ;;  %p983_p7 = scmp.lt.s32.totalorder %s212_s16, %s212_s16 }
  0x20   : > { %p966_p0 = pneg %p1304_p13  ;;  %p976_p2 = scmp.ne.s32.totalorder %s212_s16, %s975_s20 }
  0x21   : > { %p984_p8 = scmp.lt.s32.totalorder %s975_s20, %s975_s20 }
  0x22   : > { %p978_p3 = pnand %p976_p2, %p966_p0 }
  0x23   : > { %p985_p9 = por %p984_p8, %p983_p7 }
  0x24   : > { %p979_p5 = pneg %p978_p3 }
  0x26   : > { %p986_p12 = pnand %p985_p9, %p979_p5 }
  0x28   : > { %989 = shalt.err (!%p986_p12)
}
  0x29   : > { %s1172_s24 = smov 64   ;;  %s1173_s8 = smov 4  }
  0x2a   : > { %s1509_s1 = sld [smem:[#allocation18_spill]]  ;;  %s1001_s18 = scalar_lea.vmem %s231_s19, 1024 }
  0x2b   : > { %p1002_p10 = scmp.ne.s32.totalorder %s231_s19, %s1001_s18  ;;  %p1009_p6 = scmp.lt.s32.totalorder %s231_s19, %s231_s19 }
  0x2c   : > { %p1010_p1 = scmp.lt.s32.totalorder %s1001_s18, %s1001_s18 }
  0x2d   : > { %p1004_p2 = pnand %p1002_p10, %p966_p0 }
  0x2e   : > { %p1011_p7 = por %p1010_p1, %p1009_p6 }
  0x2f   : > { %p1005_p3 = pneg %p1004_p2 }
  0x30   : > { %829 = dma.hbm_to_vmem [thread:$0]  (!%p1304_p13), %s1509_s1, 1024, %s212_s16, [#allocation7], %s1172_s24, %s1172_s24, %s1173_s8  }
  0x31   : > { %p1012_p5 = pnand %p1011_p7, %p1005_p3 }
  0x33   : > { %1015 = shalt.err (!%p1012_p5)
}
  0x34   : > { %s1510_s4 = sld [smem:[#allocation20_spill]]  ;;  %s32_s16 = sadd.s32 1, %s1160_s29 }
  0x35   : > { %p33_p1 = scmp.ge.s32.totalorder %s32_s16, 3  ;;  %s35_s17 = sadd.s32 1, %s1164_s30 }
  0x36   : > { %s42_s9 = sadd.s32 1, %s1148_s26  ;;  %p49_p6 = scmp.ne.s32.totalorder %s1148_s26, %s1144_s25 }
  0x37   : > { %s1534_s16 = smov (%p33_p1, %s32_s16), 0  ;;  %s1536_s17 = smov (!%p33_p1, %s35_s17), %s1164_s30 }
  0x38   : > { %s39_s13 = ssub.s32 %s1160_s29, %s1534_s16  ;;  %p50_p10 = scmp.eq.s32.totalorder %s1168_s7, 0 }
  0x39   : > { %p37_p0 = scmp.ge.s32.totalorder %s1536_s17, 2  ;;  %p40_p8 = scmp.eq.s32.totalorder %s39_s13, 0 }
  0x3a   : > { %832 = dma.hbm_to_vmem [thread:$0]  (!%p1304_p13), %s1510_s4, 1024, %s231_s19, [#allocation7], %s1172_s24, %s1172_s24, %s1173_s8  }
  0x3b   : > { %p1337_p13 = por %p50_p10, %p49_p6  ;;  %s170_s24 = smul.u32 %s1160_s29, %s1164_s30 }
  0x3c   : > { %s1538_s17 = smov (%p37_p0, %s1536_s17), 0  ;;  %s175_s18 = sadd.s32 1, %s1136_s23 }
  0x3d   : > { %1512 = sst [smem:[#allocation17_spill]] %s1538_s17  ;;  %s171_s15 = smul.u32 %s1538_s17, %s1534_s16 }
  0x3e   : > { %s1346_s8 = scalar_select %p40_p8, %s1148_s26, %s42_s9  }
  0x3f   : > { %p843_p9 = scmp.lt.s32.totalorder %s1168_s7, 6  ;;  %s247_s20 = sand.u32 1, %s1148_s26  }
  0x40   : > { %s172_s1 = ssub.s32 %s170_s24, %s171_s15  ;;  %s722_s4 = sshll.u32 %s247_s20, 3 }
  0x41   : > { %p173_p12 = scmp.eq.s32.totalorder %s172_s1, 0  ;;  %s723_s21 = sshll.u32 %s1160_s29, 7 }
  0x42   : > { %s256_s30 = scalar_lea.hbm %s1477_s0, %s723_s21  ;;  %s251_s5 = scalar_lea.vmem [#allocation3], %s722_s4 }
  0x43   : > { %s1355_s13 = scalar_select %p173_p12, %s1136_s23, %s175_s18  }
  0x44   : > { %s258_s3 = sshll.u32 %s251_s5, 4  ;;  %p1362_p2 = pnand %p843_p9, %p1337_p13  ;;  %s259_s3 = int_to_ptr.vmem [resolvable:$true] %s258_s3 }
  0x45   : > { %s248_s17 = scalar_lea.sflag [#allocation4], %s247_s20  ;;  %s1029_s1 = scalar_lea.vmem %s259_s3, 128 }
  0x46   : > { %p1018_p3 = pneg %p1362_p2  ;;  %p1030_p7 = scmp.ne.s32.totalorder %s259_s3, %s1029_s1 }
  0x47   : > { %s1174_s24 = smov [#allocation3]  }
  0x48   : > { %p1032_p5 = pnand %p1030_p7, %p1018_p3  ;;  %s1034_s15 = sshll.u32 %s1174_s24, 4  ;;  %s1035_s15 = int_to_ptr.vmem [resolvable:$false] %s1034_s15 }
  0x49   : > { %s1036_s6 = scalar_lea.vmem %s1035_s15, 256  ;;  %p1037_p6 = scmp.lt.s32.totalorder %s259_s3, %s1035_s15 }
  0x4a   : > { %p1033_p1 = pneg %p1032_p5  ;;  %p1038_p10 = scmp.lt.s32.totalorder %s1036_s6, %s1029_s1 }
  0x4c   : > { %p1039_p0 = por %p1038_p10, %p1037_p6 }
  0x4e   : > { %p1040_p8 = pnand %p1039_p0, %p1033_p1 }
  0x50   : > { %1043 = shalt.err (!%p1040_p8)
}
  0x51   : > { %836 = dma.hbm_to_vmem [thread:$0]  (!%p1362_p2), %s256_s30, 128, %s259_s3, %s248_s17  }
  0x52   : > { %267 = sbr.rel (%p1296_p11) target bundleno = 648 (0x288), region = 44  ;;  %s269_s4 = sand.u32 (!%p1296_p11), 1, %s1144_s25  }
  0x53   : > { %s1373_s5 = sshll.u32 (!%p1296_p11), %s269_s4, 3  ;;  %s270_s21 = scalar_lea.sflag (!%p1296_p11), [#allocation4], %s269_s4 }
  0x54   : > { %s273_s12 = scalar_lea.vmem (!%p1296_p11), [#allocation3], %s1373_s5 }
  0x57   : > { %1115 = dma.done.wait (%p1280_p4), %s270_s21, 128  }
  0x58   : > { %1117 = vsyncadd (%p1280_p4), %s270_s21, 4294967168  ;;  %p1514_p13 = scmp.ne.s32.totalorder %s1501_s10, 0 }
  0x5a   : > { %1119 = dma.done.wait (%p1514_p13), [#allocation7], 2048  }
  0x5b   : > { %1121 = vsyncadd (%p1514_p13), [#allocation7], 4294965248  ;;  %s307_s3 = sand.u32 1, %s1132_s22   ;;  %v1175_v0 = vmov 0.0   ;;  %vm1176_vm0 = vmmov 0   ;;  %v944_v1 = vld [vmem:[#allocation6 + $0x38] sm:$0xff]  }
  0x5c   : > { %s1387_s30 = sshll.u32 %s307_s3, 3  ;;  %774 = vmatprep.subr.bf16.mxu0 %v1175_v0  ;;  %790 = vmatprep.mubr.msk.bf16.mxu0 %vm1176_vm0, %v1175_v0  ;;  %v945_v2 = vld [vmem:[#allocation6 + $0x30] sm:$0xff]   ;;  %v946_v3 = vld [vmem:[#allocation6 + $0x28] sm:$0xff]   ;;  %v947_v4 = vld [vmem:[#allocation6 + $0x20] sm:$0xff]   ;;  %p737_p4 = scmp.ne.s32.totalorder %s1156_s28, 0 }
  0x5d   : > { %775 = vmatpush3.bf16.msra.mxu0 %v944_v1  ;;  %v948_v5 = vld [vmem:[#allocation6 + $0x18] sm:$0xff]   ;;  %v949_v6 = vld [vmem:[#allocation6 + $0x10] sm:$0xff]   ;;  %v950_v7 = vld [vmem:[#allocation6 + $0x8] sm:$0xff]   ;;  %s309_s10 = scalar_lea.vmem [#allocation9], %s1387_s30  ;;  %p738_p11 = scmp.ne.s32.totalorder (!%p737_p4), %s1152_s27, 0 }
  0x5e   : > { %776 = vmatprep.subr.bf16.mxu0 %v1175_v0  ;;  %v951_v8 = vld [vmem:[#allocation6] sm:$0xff]   ;;  %v1391_v9 = vld [vmem:[%s273_s12] sm:$0xff] }
  0x5f   : > { %v313_v10 = vpack.c.bf16 %v1391_v9, %v1391_v9 }
  0x61   : > { %777 = vmatpush3.bf16.msra.mxu0 %v945_v2 }
  0x62   : > { %778 = vmatprep.subr.bf16.mxu0 %v1175_v0 }
  0x65   : > { %779 = vmatpush3.bf16.msra.mxu0 %v946_v3 }
  0x66   : > { %780 = vmatprep.subr.bf16.mxu0 %v1175_v0 }
  0x69   : > { %781 = vmatpush3.bf16.msra.mxu0 %v947_v4 }
  0x6a   : > { %782 = vmatprep.subr.bf16.mxu0 %v1175_v0 }
  0x6d   : > { %783 = vmatpush3.bf16.msra.mxu0 %v948_v5 }
  0x6e   : > { %784 = vmatprep.subr.bf16.mxu0 %v1175_v0 }
  0x71   : > { %785 = vmatpush3.bf16.msra.mxu0 %v949_v6 }
  0x72   : > { %786 = vmatprep.subr.bf16.mxu0 %v1175_v0 }
  0x75   : > { %787 = vmatpush3.bf16.msra.mxu0 %v950_v7 }
  0x76   : > { %788 = vmatprep.subr.bf16.mxu0 %v1175_v0 }
  0x79   : > { %789 = vmatpush3.bf16.msra.mxu0 %v951_v8 }
  0x7c   : > { %791 = vmatmul.mubr.bf16.vlgmr.msra.gmra.mxu0 %v313_v10 }
 0x13c   : > { %v1395_v11 = vpop.f32.mrf.mxu0 }
 0x13e   : > { %v792_v12 = vpop.f32.mrf.mxu0  ;;  %421 = sbr.rel (%p737_p4) target bundleno = 383 (0x17f), region = 60 }
 0x140   : > { %v415_v13 = vpop.f32.mrf.mxu0 }
 0x142   : > { %v793_v14 = vpop.f32.mrf.mxu0 }
 0x143   : > { %425 = sbr.rel (%p738_p11) target bundleno = 330 (0x14a), region = 64 }
 0x148   : > { %v1177_v15 = vmov 0.0  }
 0x149   : > { %426 = vst [vmem:[#allocation2] sm:$0x3] %v1177_v15 }
 0x14a PF: > { %v428_v16 = vrot.slane %v1395_v11, 4  ;;  %v437_v17 = vmul.f32 %v1395_v11, %v1395_v11  ;;  %p739_p9 = scmp.ne.s32.totalorder %s1152_s27, 2 }
 0x14b   : > { %s1515_s18 = sld [smem:[#allocation19_spill]] (!%p739_p9) }
 0x14c   : > { %v429_v18 = vadd.f32 %v428_v16, %v1395_v11  ;;  %v438_v19 = vrot.slane %v437_v17, 4 }
 0x14e   : > { %v430_v20 = vrot.slane %v429_v18, 2  ;;  %v439_v21 = vadd.f32 %v438_v19, %v437_v17 }
 0x150   : > { %v431_v22 = vadd.f32 %v430_v20, %v429_v18  ;;  %v440_v23 = vrot.slane %v439_v21, 2  ;;  %v427_v26 = vld [vmem:[#allocation2] sm:$0x1]  ;;  %v436_v29 = vld [vmem:[#allocation2 + $0x1] sm:$0x1] }
 0x152   : > { %v432_v24 = vrot.slane %v431_v22, 1  ;;  %v441_v25 = vadd.f32 %v440_v23, %v439_v21 }
 0x154   : > { %v433_v27 = vadd.f32 %v432_v24, %v431_v22  ;;  %v442_v28 = vrot.slane %v441_v25, 1 }
 0x156   : > { %v434_v30 = vadd.f32 %v433_v27, %v427_v26  ;;  %v443_v31 = vadd.f32 %v442_v28, %v441_v25  ;;  %449 = sbr.rel (%p739_p9) target bundleno = 383 (0x17f), region = 68 }
 0x158   : > { %435 = vst [vmem:[#allocation2] sm:$0x1] %v434_v30  ;;  %v444_v32 = vadd.f32 %v443_v31, %v436_v29 }
 0x15a   : > { %445 = vst [vmem:[#allocation2 + $0x1] sm:$0x1] %v444_v32 }
 0x15b   : > { %v457_v41 = vld [vmem:[%s1479_s2] sm:$0x1] }
 0x15c   : > { %v462_v44 = vld [vmem:[%s1515_s18] sm:$0x1] }
 0x15f   : > { %v450_v33 = vld [vmem:[#allocation2] sm:$0x1] }
 0x160   : > { %v451_v35 = vmul.f32 0.05, %v450_v33 }
 0x161   : > { %v452_v34 = vld [vmem:[#allocation2 + $0x1] sm:$0x1] }
 0x162   : > { %v453_v36 = vmul.f32 0.05, %v452_v34  ;;  %v454_v37 = vmul.f32 %v451_v35, %v451_v35 }
 0x164   : > { %v455_v38 = vsub.f32 %v453_v36, %v454_v37 }
 0x166   : > { %v456_v39 = vmax.f32 %v455_v38, 0.0 }
 0x168   : > { %v458_v40 = vadd.f32 1e-05, %v456_v39 }
 0x16a   : > { %952 = vrsqrt.f32 %v458_v40 }
 0x177   : > { %v953_v42 = vpop.eup %952 }
 0x178   : > { %v460_v43 = vmul.f32 %v953_v42, %v457_v41 }
 0x17a   : > { %461 = vst [vmem:[#allocation2] sm:$0x1] %v460_v43  ;;  %v463_v45 = vmul.f32 %v460_v43, %v451_v35 }
 0x17c   : > { %v464_v46 = vsub.f32 %v462_v44, %v463_v45 }
 0x17e   : > { %465 = vst [vmem:[#allocation2 + $0x1] sm:$0x1] %v464_v46 }
 0x17f PF: > { %p740_p12 = scmp.ne.s32.totalorder %s1156_s28, 1 }
 0x180   : > { %s1516_s1 = sld [smem:[#allocation21_spill]] (!%p740_p12) }
 0x181   : > { %469 = sbr.rel (%p740_p12) target bundleno = 622 (0x26e), region = 72 }
 0x186   : > { %v954_v47 = vld [vmem:[#allocation8 + $0x38] sm:$0xff]   ;;  %v1178_v48 = vmov 0.0   ;;  %v955_v49 = vld [vmem:[#allocation8 + $0x30] sm:$0xff]   ;;  %vm1179_vm1 = vmmov 0   ;;  %v956_v50 = vld [vmem:[#allocation8 + $0x28] sm:$0xff]  }
 0x187   : > { %794 = vmatprep.subr.bf16.mxu0 %v1178_v48  ;;  %810 = vmatprep.mubr.msk.bf16.mxu0 %vm1179_vm1, %v1178_v48  ;;  %v741_v51 = vld [vmem:[#allocation2] ss:$0 sm:$0xff]  ;;  %v742_v52 = vld [vmem:[#allocation2 + $0x1] ss:$0 sm:$0xff]  ;;  %v957_v54 = vld [vmem:[#allocation8 + $0x20] sm:$0xff]  }
 0x188   : > { %795 = vmatpush3.bf16.msra.mxu0 %v954_v47  ;;  %v475_v53 = vmul.f32 %v741_v51, %v1395_v11  ;;  %v958_v57 = vld [vmem:[#allocation8 + $0x18] sm:$0xff]   ;;  %v959_v58 = vld [vmem:[#allocation8 + $0x10] sm:$0xff]   ;;  %v960_v59 = vld [vmem:[#allocation8 + $0x8] sm:$0xff]  }
 0x189   : > { %796 = vmatprep.subr.bf16.mxu0 %v1178_v48  ;;  %v961_v60 = vld [vmem:[#allocation8] sm:$0xff]   ;;  %v743_v2 = vld [vmem:[%s1516_s1] ss:$0 sm:$0xff] }
 0x18a   : > { %v481_v55 = vadd.f32 %v742_v52, %v475_v53 }
 0x18c   : > { %797 = vmatpush3.bf16.msra.mxu0 %v955_v49  ;;  %v483_v56 = vmul.f32 0.70710677, %v481_v55  ;;  %v482_v61 = vmul.f32 0.5, %v481_v55 }
 0x18d   : > { %798 = vmatprep.subr.bf16.mxu0 %v1178_v48 }
 0x18e   : > { %962 = verf.f32 %v483_v56 }
 0x190   : > { %799 = vmatpush3.bf16.msra.mxu0 %v956_v50 }
 0x191   : > { %800 = vmatprep.subr.bf16.mxu0 %v1178_v48 }
 0x194   : > { %801 = vmatpush3.bf16.msra.mxu0 %v957_v54 }
 0x195   : > { %802 = vmatprep.subr.bf16.mxu0 %v1178_v48 }
 0x198   : > { %803 = vmatpush3.bf16.msra.mxu0 %v958_v57 }
 0x199   : > { %804 = vmatprep.subr.bf16.mxu0 %v1178_v48 }
 0x19b   : > { %v963_v62 = vpop.eup %962 }
 0x19c   : > { %805 = vmatpush3.bf16.msra.mxu0 %v959_v58  ;;  %v485_v63 = vadd.f32 1.0, %v963_v62 }
 0x19d   : > { %806 = vmatprep.subr.bf16.mxu0 %v1178_v48 }
 0x19e   : > { %v486_v0 = vmul.f32 %v485_v63, %v482_v61 }
 0x1a0   : > { %807 = vmatpush3.bf16.msra.mxu0 %v960_v59  ;;  %v487_v1 = vpack.c.bf16 %v486_v0, %v486_v0 }
 0x1a1   : > { %808 = vmatprep.subr.bf16.mxu0 %v1178_v48 }
 0x1a4   : > { %809 = vmatpush3.bf16.msra.mxu0 %v961_v60 }
 0x1a7   : > { %811 = vmatmul.mubr.bf16.vlgmr.msra.gmra.mxu0 %v487_v1 }
 0x267   : > { %v593_v3 = vpop.f32.mrf.mxu0 }
 0x268   : > { %v594_v4 = vadd.f32 %v743_v2, %v593_v3 }
 0x269   : > { %v812_v5 = vpop.f32.mrf.mxu0 }
 0x26a   : > { %v599_v6 = vadd.f32 %v594_v4, %v1391_v9 }
 0x26b   : > { %v596_v7 = vpop.f32.mrf.mxu0 }
 0x26c   : > { %600 = vst [vmem:[%s309_s10] sm:$0xff] %v599_v6 }
 0x26d   : > { %v813_v8 = vpop.f32.mrf.mxu0 }
 0x26e PF: > { %s1517_s24 = sld [smem:[#allocation15_spill]]  ;;  %s609_s15 = smul.u32 %s1152_s27, %s1156_s28 }
 0x26f   : > { %s616_s6 = sshll.u32 %s309_s10, 4  ;;  %s1518_s12 = sld [smem:[#allocation22_spill]]  ;;  %s617_s6 = int_to_ptr.vmem [resolvable:$true] %s616_s6 }
 0x270   : > { %s753_s4 = sshll.u32 %s609_s15, 7  ;;  %s602_s14 = scalar_lea.sflag [#allocation5], %s307_s3 }
 0x271   : > { %s1044_s17 = scalar_lea.vmem %s617_s6, 128  ;;  %s1180_s19 = smov [#allocation9]  }
 0x272   : > { %p1045_p2 = scmp.ne.s32.totalorder %s617_s6, %s1044_s17  ;;  %s1048_s18 = sshll.u32 %s1180_s19, 4  ;;  %s1049_s18 = int_to_ptr.vmem [resolvable:$false] %s1048_s18 }
 0x273   : > { %s1050_s20 = scalar_lea.vmem %s1049_s18, 256  ;;  %p1051_p1 = scmp.lt.s32.totalorder %s617_s6, %s1049_s18 }
 0x274   : > { %p1519_p3 = scmp.ne.s32.totalorder %s1517_s24, 0  ;;  %p1052_p6 = scmp.lt.s32.totalorder %s1050_s20, %s1044_s17 }
 0x275   : > { %s614_s11 = scalar_lea.hbm %s1518_s12, %s753_s4 }
 0x276   : > { %p1046_p7 = pnand %p1045_p2, %p1519_p3  ;;  %p1053_p10 = por %p1052_p6, %p1051_p1 }
 0x278   : > { %p1047_p5 = pneg %p1046_p7 }
 0x27a   : > { %p1054_p0 = pnand %p1053_p10, %p1047_p5 }
 0x27c   : > { %1057 = shalt.err (!%p1054_p0)
}
 0x27d   : > { %s1058_s27 = scalar_lea.hbm %s614_s11, 128  ;;  %s1062_s30 = scalar_lea.hbm %s1518_s12, 384 }
 0x27e   : > { %p1059_p8 = scmp.ne.s32.totalorder %s614_s11, %s1058_s27  ;;  %p1063_p11 = scmp.lt.s32.totalorder %s614_s11, %s1518_s12 }
 0x27f   : > { %p1064_p9 = scmp.lt.s32.totalorder %s1062_s30, %s1058_s27 }
 0x280   : > { %p1060_p13 = pnand %p1059_p8, %p1519_p3 }
 0x281   : > { %p1065_p12 = por %p1064_p9, %p1063_p11 }
 0x282   : > { %p1061_p4 = pneg %p1060_p13 }
 0x284   : > { %p1066_p2 = pnand %p1065_p12, %p1061_p4 }
 0x286   : > { %1069 = shalt.err (!%p1066_p2)
}
 0x287   : > { %824 = dma.vmem_to_hbm [thread:$0]  (%p1519_p3), %s617_s6, 128, %s614_s11, %s602_s14  }
 0x288 PF: > { %s1520_s1 = sld [smem:[#allocation13_spill]]  ;;  %p846_p7 = scmp.ge.s32.totalorder %s1168_s7, 2 }
 0x289   : > { %s1521_s15 = sld [smem:[#allocation16_spill]] }
 0x28e   : > { %s628_s4 = sand.u32 1, %s1520_s1  }
 0x28f   : > { %p1522_p5 = scmp.ne.s32.totalorder %s1521_s15, 0  ;;  %s629_s5 = scalar_lea.sflag [#allocation5], %s628_s4 }
 0x291   : > { %p838_p1 = pnand %p846_p7, %p1522_p5 }
 0x293   : > { %p839_p6 = pneg %p838_p1 }
 0x295   : > { %1123 = dma.done.wait (%p839_p6), %s629_s5, 128  }
 0x296   : > { %1125 = vsyncadd (%p839_p6), %s629_s5, 4294967168  ;;  %s23_s7 = sadd.s32 1, %s1168_s7   ;;  %s1523_s28 = sld [smem:[#allocation14_spill]] }
 0x297   : > { %p20_p10 = scmp.ge.s32.totalorder %s23_s7, 8   ;;  %s1524_s30 = sld [smem:[#allocation17_spill]] }
 0x298   : > { %s1525_s21 = smov %s1132_s22  ;;  %s1526_s22 = smov %s1136_s23 }
 0x299   : > { %s1527_s23 = smov %s1355_s13  ;;  %s1528_s24 = smov %s1144_s25 }
 0x29a   : > { %s1529_s25 = smov %s1148_s26  ;;  %s1530_s26 = smov %s1346_s8 }
 0x29b   : > { %s1531_s27 = smov %s1160_s29  ;;  %s1532_s29 = smov %s1534_s16 }
 0x29c   :  { %22 = sbr.rel (!%p20_p10) target bundleno = 16 (0x10), region = 113 }
 0x2a1   :  { %634 = vsyncpa [#allocation4], 1 }
 0x2a2   :  { %636 = vsyncpa [#allocation4 + $0x1], 1 }
 0x2a3   :  { %637 = vsyncpa [#allocation7], 1 }
 0x2a4   :  { %638 = vsyncpa [#allocation5], 1 }
 0x2a5   :  { %640 = vsyncpa [#allocation5 + $0x1], 1 }

</bundles_post_ra>
